<compile_context>
chip_gen: v7x
topology: tpu7x:2x2x1
jax: 0.10.0
libtpu: 0.0.40
codegen_flags: <defaults>
</compile_context>

<pallas_src>
import jax
import jax.numpy as jnp
from jax.experimental import pallas as pl
from jax.experimental.pallas import tpu as pltpu

EPS = 1e-5


# ----------------------------- Pallas kernel --------------------------------

def _make_resblock_kernel(N, H, W, C, Ch):
    P = N * H * W
    inv_n = 1.0 / float(P)
    pow2 = ((W & (W - 1)) == 0) and ((H & (H - 1)) == 0)
    log2w = W.bit_length() - 1
    OFFSETS = [(dh, dw) for dh in (-1, 0, 1) for dw in (-1, 0, 1)]

    def kernel(x_ref, w1_ref, g1_ref, b1_ref, w2_ref, g2_ref, b2_ref,
               w3_ref, g3_ref, b3_ref, out_ref):

        def bn(h, g_ref, b_ref, relu):
            # Single-pass training-mode BatchNorm over the P = N*H*W lane axis.
            # var = E[x^2] - E[x]^2 (biased); activations here are O(1), so
            # fp32 cancellation is negligible.
            s = jnp.sum(h, axis=1, keepdims=True)
            s2 = jnp.sum(h * h, axis=1, keepdims=True)
            mean = s * inv_n
            var = s2 * inv_n - mean * mean
            scale = g_ref[...] * jax.lax.rsqrt(var + EPS)   # (Cx, 1)
            shift = b_ref[...] - mean * scale               # (Cx, 1)
            out = h * scale + shift                          # one VPU pass
            return jnp.maximum(out, 0.0) if relu else out

        # ---- downsample: masked 1x1 conv (matmul) + BN + ReLU ----
        h1 = jnp.dot(w1_ref[...], x_ref[...],
                     preferred_element_type=jnp.float32)     # (Ch, P)
        h1 = bn(h1, g1_ref, b1_ref, relu=True)

        # ---- in-kernel boundary-validity masks (no HBM mask input) ----
        lane = jax.lax.broadcasted_iota(jnp.int32, (1, P), 1)
        if pow2:
            w_pos = lane & (W - 1)
            h_pos = (lane >> log2w) & (H - 1)
        else:
            w_pos = lane % W
            h_pos = (lane // W) % H
        top_ok = jnp.where(h_pos > 0, 1.0, 0.0)        # dh = -1 stays in-image
        bot_ok = jnp.where(h_pos < H - 1, 1.0, 0.0)    # dh = +1 stays in-image
        left_ok = jnp.where(w_pos > 0, 1.0, 0.0)       # dw = -1 stays in-image
        right_ok = jnp.where(w_pos < W - 1, 1.0, 0.0)  # dw = +1 stays in-image
        row_m = {-1: top_ok, 0: None, 1: bot_ok}
        col_m = {-1: left_ok, 0: None, 1: right_ok}

        # ---- middle: masked 3x3 'same' conv as ONE im2col matmul ----
        # Each tap is a circular lane-roll of h1; wrapped lanes land exactly on
        # out-of-image positions, which the multiply-mask zeroes.
        taps = []
        for dh, dw in OFFSETS:
            delta = dh * W + dw
            t = h1 if delta == 0 else pltpu.roll(h1, (-delta) % P, axis=1)
            m = row_m[dh]
            cm = col_m[dw]
            if cm is not None:
                m = cm if m is None else m * cm
            if m is not None:
                t = t * m                      # multiply-mask (no cmp+select)
            taps.append(t)
        # Sublane-aligned concat (each piece is exactly Ch sublanes).
        im2col = jnp.concatenate(taps, axis=0)               # (9*Ch, P)
        h2 = jnp.dot(w2_ref[...], im2col,
                     preferred_element_type=jnp.float32)     # (Ch, P)
        h2 = bn(h2, g2_ref, b2_ref, relu=True)

        # ---- upsample: masked 1x1 conv (matmul) + BN (no ReLU) ----
        h3 = jnp.dot(w3_ref[...], h2,
                     preferred_element_type=jnp.float32)     # (C, P)
        h3 = bn(h3, g3_ref, b3_ref, relu=False)

        # ---- residual add (x re-read from VMEM here) + final ReLU ----
        out_ref[...] = jnp.maximum(h3 + x_ref[...], 0.0).astype(out_ref.dtype)

    return kernel


def resblock_pallas(x_nchw, params):
    N, C, H, W = x_nchw.shape
    Ch = C // 2
    P = N * H * W

    # channels-first, flattened-spatial layout: lane axis = P (lane-dense).
    x_cp = jnp.transpose(x_nchw, (1, 0, 2, 3)).reshape(C, P)

    # Kernel-side weight / BN parameter layouts (masks already folded in).
    w1k = params["w1"][:, :, 0, 0]                                   # (Ch, C)
    w2k = jnp.transpose(params["w2"], (0, 2, 3, 1)).reshape(Ch, 9 * Ch)
    w3k = params["w3"][:, :, 0, 0]                                   # (C, Ch)
    g1 = params["g1"].reshape(Ch, 1); b1 = params["b1"].reshape(Ch, 1)
    g2 = params["g2"].reshape(Ch, 1); b2 = params["b2"].reshape(Ch, 1)
    g3 = params["g3"].reshape(C, 1);  b3 = params["b3"].reshape(C, 1)

    def full(shape):
        n = len(shape)
        return pl.BlockSpec(shape, lambda i, _n=n: (0,) * _n)

    kernel = _make_resblock_kernel(N, H, W, C, Ch)

    flops = 2 * P * (C * Ch + 9 * Ch * Ch + Ch * C) + 30 * P * Ch + 12 * P * C
    bytes_accessed = 4 * (2 * C * P + 2 * Ch * C + 9 * Ch * Ch
                          + 4 * Ch + 4 * C)
    cost = pl.CostEstimate(flops=int(flops),
                           transcendentals=int(2 * Ch + C),
                           bytes_accessed=int(bytes_accessed))

    # Single block / single grid step: the whole problem fits in VMEM at demo
    # size, and training-mode BN needs the full N*H*W reduction in one pass
    # (see TODO at the top for the production-scale tiled two-pass plan).
    out_cp = pl.pallas_call(
        kernel,
        out_shape=jax.ShapeDtypeStruct((C, P), jnp.float32),
        grid=(1,),
        in_specs=[
            full((C, P)),
            full((Ch, C)), full((Ch, 1)), full((Ch, 1)),
            full((Ch, 9 * Ch)), full((Ch, 1)), full((Ch, 1)),
            full((C, Ch)), full((C, 1)), full((C, 1)),
        ],
        out_specs=full((C, P)),
        cost_estimate=cost,
    )(x_cp, w1k, g1, b1, w2k, g2, b2, w3k, g3, b3)

    # back to NCHW
    return jnp.transpose(out_cp.reshape(C, N, H, W), (1, 0, 2, 3))


# ----------------------- MaskedConv2d 'B' mask construction -----------------

def _channel_mask_b(cout, cin):
    tmpl = jnp.array([[1., 0., 0.], [1., 1., 0.], [1., 1., 1.]], jnp.float32)
    o = jnp.arange(cout) % 3
    i = jnp.arange(cin) % 3
    return tmpl[o[:, None], i[None, :]]


def masked_conv_mask_b(cout, cin, k):
    """Mask of MaskedConv2d(mask_type='B'); PyTorch weight layout (cout,cin,k,k)."""
    m = jnp.zeros((cout, cin, k, k), jnp.float32)
    m = m.at[:, :, :k // 2, :].set(1.0)
    m = m.at[:, :, k // 2, :k // 2 + 1].set(1.0)
    if cin != 1:
        m = m.at[:, :, k // 2, k // 2].set(_channel_mask_b(cout, cin))
    return m


def init_params(key, C):
    # Deterministic synthetic parameters (same shapes as the PyTorch module),
    # kept in PyTorch layout; wrappers derive their own layouts from these.
    Ch = C // 2
    ks = jax.random.split(key, 9)
    w1 = jax.random.normal(ks[0], (Ch, C, 1, 1), jnp.float32) * 0.2
    w2 = jax.random.normal(ks[1], (Ch, Ch, 3, 3), jnp.float32) * 0.2
    w3 = jax.random.normal(ks[2], (C, Ch, 1, 1), jnp.float32) * 0.2
    # `self.weight *= self.mask` folded into the weights once, at setup time.
    w1 = w1 * masked_conv_mask_b(Ch, C, 1)
    w2 = w2 * masked_conv_mask_b(Ch, Ch, 3)
    w3 = w3 * masked_conv_mask_b(C, Ch, 1)
    g1 = 1.0 + 0.1 * jax.random.normal(ks[3], (Ch,), jnp.float32)
    b1 = 0.1 * jax.random.normal(ks[4], (Ch,), jnp.float32)
    g2 = 1.0 + 0.1 * jax.random.normal(ks[5], (Ch,), jnp.float32)
    b2 = 0.1 * jax.random.normal(ks[6], (Ch,), jnp.float32)
    g3 = 1.0 + 0.1 * jax.random.normal(ks[7], (C,), jnp.float32)
    b3 = 0.1 * jax.random.normal(ks[8], (C,), jnp.float32)
    return dict(w1=w1, w2=w2, w3=w3, g1=g1, b1=b1, g2=g2, b2=b2, g3=g3, b3=b3)


# ----------------------------- pure-JAX reference ----------------------------

def resblock_reference(x_nchw, params):
    # Direct NCHW mirror of the PyTorch module (training-mode BatchNorm).
    N, C, H, W = x_nchw.shape
    Ch = C // 2

    def bn(h, g, b):
        mean = jnp.mean(h, axis=(0, 2, 3), keepdims=True)
        var = jnp.mean((h - mean) ** 2, axis=(0, 2, 3), keepdims=True)
        return ((h - mean) * jax.lax.rsqrt(var + EPS)
                * g.reshape(1, -1, 1, 1) + b.reshape(1, -1, 1, 1))

    w1 = params["w1"][:, :, 0, 0]
    w2 = params["w2"]
    w3 = params["w3"][:, :, 0, 0]

    h = jnp.einsum('nchw,dc->ndhw', x_nchw, w1)
    h = jax.nn.relu(bn(h, params["g1"], params["b1"]))
    hp = jnp.pad(h, ((0, 0), (0, 0), (1, 1), (1, 1)))
    acc = jnp.zeros((N, Ch, H, W), jnp.float32)
    for kh in range(3):
        for kw in range(3):
            acc = acc + jnp.einsum('nchw,dc->ndhw',
                                   hp[:, :, kh:kh + H, kw:kw + W],
                                   w2[:, :, kh, kw])
    h = jax.nn.relu(bn(acc, params["g2"], params["b2"]))
    h = jnp.einsum('nchw,dc->ndhw', h, w3)
    h = bn(h, params["g3"], params["b3"])
    return jax.nn.relu(h + x_nchw)


# ----------------------------------- main ------------------------------------

if __name__ == "__main__":
    key = jax.random.PRNGKey(0)
    kx, kp = jax.random.split(key)

    # PyTorch input is NCHW: (N=2, C=16, H=8, W=8)  ->  P = N*H*W = 128 lanes.
    N, C, H, W = 2, 16, 8, 8
    x_nchw = jax.random.normal(kx, (N, C, H, W), jnp.float32)
    params = init_params(kp, C)

    out = resblock_pallas(x_nchw, params)
    out = jax.block_until_ready(out)

    ref = resblock_reference(x_nchw, params)
    assert out.shape == (N, C, H, W)
    max_err = float(jnp.max(jnp.abs(out - ref)))
    assert jnp.allclose(out, ref, rtol=1e-4, atol=5e-4), f"max abs err {max_err}"

    print("KERNEL_OK")
</pallas_src>

<mosaic_0001>
module attributes {stable_mosaic.version = 11 : i64} {
  func.func @kernel(%arg0: i32, %arg1: memref<16x128xf32, #tpu.memory_space<vmem>>, %arg2: memref<8x16xf32, #tpu.memory_space<vmem>>, %arg3: memref<8x1xf32, #tpu.memory_space<vmem>>, %arg4: memref<8x1xf32, #tpu.memory_space<vmem>>, %arg5: memref<8x72xf32, #tpu.memory_space<vmem>>, %arg6: memref<8x1xf32, #tpu.memory_space<vmem>>, %arg7: memref<8x1xf32, #tpu.memory_space<vmem>>, %arg8: memref<16x8xf32, #tpu.memory_space<vmem>>, %arg9: memref<16x1xf32, #tpu.memory_space<vmem>>, %arg10: memref<16x1xf32, #tpu.memory_space<vmem>>, %arg11: memref<16x128xf32, #tpu.memory_space<vmem>>) attributes {dimension_semantics = [#tpu.dimension_semantics<arbitrary>], iteration_bounds = array<i64: 1>, scalar_prefetch = 0 : i64, scratch_operands = 0 : i64, tpu.core_type = #tpu.core_type<tc>, window_params = [{pipeline_mode = #tpu.pipeline_mode<synchronous>, transform_indices = @transform_0, window_bounds = array<i64: 16, 128>}, {pipeline_mode = #tpu.pipeline_mode<synchronous>, transform_indices = @transform_1, window_bounds = array<i64: 8, 16>}, {pipeline_mode = #tpu.pipeline_mode<synchronous>, transform_indices = @transform_2, window_bounds = array<i64: 8, 1>}, {pipeline_mode = #tpu.pipeline_mode<synchronous>, transform_indices = @transform_3, window_bounds = array<i64: 8, 1>}, {pipeline_mode = #tpu.pipeline_mode<synchronous>, transform_indices = @transform_4, window_bounds = array<i64: 8, 72>}, {pipeline_mode = #tpu.pipeline_mode<synchronous>, transform_indices = @transform_5, window_bounds = array<i64: 8, 1>}, {pipeline_mode = #tpu.pipeline_mode<synchronous>, transform_indices = @transform_6, window_bounds = array<i64: 8, 1>}, {pipeline_mode = #tpu.pipeline_mode<synchronous>, transform_indices = @transform_7, window_bounds = array<i64: 16, 8>}, {pipeline_mode = #tpu.pipeline_mode<synchronous>, transform_indices = @transform_8, window_bounds = array<i64: 16, 1>}, {pipeline_mode = #tpu.pipeline_mode<synchronous>, transform_indices = @transform_9, window_bounds = array<i64: 16, 1>}, {pipeline_mode = #tpu.pipeline_mode<synchronous>, transform_indices = @transform_10, window_bounds = array<i64: 16, 128>}]} {
    %c0 = arith.constant 0 : index
    %c0_0 = arith.constant 0 : index
    %0 = vector.load %arg2[%c0, %c0_0] : memref<8x16xf32, #tpu.memory_space<vmem>>, vector<8x16xf32>
    %c0_1 = arith.constant 0 : index
    %c0_2 = arith.constant 0 : index
    %1 = vector.load %arg1[%c0_1, %c0_2] : memref<16x128xf32, #tpu.memory_space<vmem>>, vector<16x128xf32>
    %cst = arith.constant dense<0.000000e+00> : vector<8x128xf32>
    %2 = tpu.matmul %0, %1, %cst {dimension_numbers = #tpu.dot_dimension_numbers<[1], [0], [0], [1], [0, 0, 1, 1], [], []>} : vector<8x16xf32>, vector<16x128xf32>, vector<8x128xf32> -> vector<8x128xf32>
    %cst_3 = arith.constant dense<0.000000e+00> : vector<8xf32>
    %3 = vector.multi_reduction <add>, %2, %cst_3 [1] : vector<8x128xf32> to vector<8xf32>
    %4 = vector.shape_cast %3 : vector<8xf32> to vector<8x1xf32>
    %5 = arith.mulf %2, %2 : vector<8x128xf32>
    %cst_4 = arith.constant dense<0.000000e+00> : vector<8xf32>
    %6 = vector.multi_reduction <add>, %5, %cst_4 [1] : vector<8x128xf32> to vector<8xf32>
    %7 = vector.shape_cast %6 : vector<8xf32> to vector<8x1xf32>
    %cst_5 = arith.constant 7.812500e-03 : f32
    %8 = vector.broadcast %cst_5 : f32 to vector<8x1xf32>
    %9 = arith.mulf %4, %8 : vector<8x1xf32>
    %cst_6 = arith.constant 7.812500e-03 : f32
    %10 = vector.broadcast %cst_6 : f32 to vector<8x1xf32>
    %11 = arith.mulf %7, %10 : vector<8x1xf32>
    %12 = arith.mulf %9, %9 : vector<8x1xf32>
    %13 = arith.subf %11, %12 : vector<8x1xf32>
    %c0_7 = arith.constant 0 : index
    %c0_8 = arith.constant 0 : index
    %14 = vector.load %arg3[%c0_7, %c0_8] : memref<8x1xf32, #tpu.memory_space<vmem>>, vector<8x1xf32>
    %cst_9 = arith.constant 9.99999974E-6 : f32
    %15 = vector.broadcast %cst_9 : f32 to vector<8x1xf32>
    %16 = arith.addf %13, %15 : vector<8x1xf32>
    %17 = math.rsqrt %16 : vector<8x1xf32>
    %18 = arith.mulf %14, %17 : vector<8x1xf32>
    %c0_10 = arith.constant 0 : index
    %c0_11 = arith.constant 0 : index
    %19 = vector.load %arg4[%c0_10, %c0_11] : memref<8x1xf32, #tpu.memory_space<vmem>>, vector<8x1xf32>
    %20 = arith.mulf %9, %18 : vector<8x1xf32>
    %21 = arith.subf %19, %20 : vector<8x1xf32>
    %22 = vector.broadcast %18 : vector<8x1xf32> to vector<8x128xf32>
    %23 = arith.mulf %2, %22 : vector<8x128xf32>
    %24 = vector.broadcast %21 : vector<8x1xf32> to vector<8x128xf32>
    %25 = arith.addf %23, %24 : vector<8x128xf32>
    %cst_12 = arith.constant 0.000000e+00 : f32
    %26 = vector.broadcast %cst_12 : f32 to vector<8x128xf32>
    %27 = arith.maximumf %25, %26 : vector<8x128xf32>
    %28 = tpu.iota {dimensions = array<i32: 1>} : vector<1x128xi32>
    %c7_i32 = arith.constant 7 : i32
    %29 = vector.broadcast %c7_i32 : i32 to vector<1x128xi32>
    %30 = arith.andi %28, %29 : vector<1x128xi32>
    %c3_i32 = arith.constant 3 : i32
    %31 = vector.broadcast %c3_i32 : i32 to vector<1x128xi32>
    %32 = arith.shrsi %28, %31 : vector<1x128xi32>
    %c7_i32_13 = arith.constant 7 : i32
    %33 = vector.broadcast %c7_i32_13 : i32 to vector<1x128xi32>
    %34 = arith.andi %32, %33 : vector<1x128xi32>
    %c0_i32 = arith.constant 0 : i32
    %35 = vector.broadcast %c0_i32 : i32 to vector<1x128xi32>
    %36 = arith.cmpi sgt, %34, %35 : vector<1x128xi32>
    %cst_14 = arith.constant 1.000000e+00 : f32
    %cst_15 = arith.constant 0.000000e+00 : f32
    %37 = vector.broadcast %cst_14 : f32 to vector<1x128xf32>
    %38 = vector.broadcast %cst_15 : f32 to vector<1x128xf32>
    %39 = arith.select %36, %37, %38 : vector<1x128xi1>, vector<1x128xf32>
    %c7_i32_16 = arith.constant 7 : i32
    %40 = vector.broadcast %c7_i32_16 : i32 to vector<1x128xi32>
    %41 = arith.cmpi slt, %34, %40 : vector<1x128xi32>
    %cst_17 = arith.constant 1.000000e+00 : f32
    %cst_18 = arith.constant 0.000000e+00 : f32
    %42 = vector.broadcast %cst_17 : f32 to vector<1x128xf32>
    %43 = vector.broadcast %cst_18 : f32 to vector<1x128xf32>
    %44 = arith.select %41, %42, %43 : vector<1x128xi1>, vector<1x128xf32>
    %c0_i32_19 = arith.constant 0 : i32
    %45 = vector.broadcast %c0_i32_19 : i32 to vector<1x128xi32>
    %46 = arith.cmpi sgt, %30, %45 : vector<1x128xi32>
    %cst_20 = arith.constant 1.000000e+00 : f32
    %cst_21 = arith.constant 0.000000e+00 : f32
    %47 = vector.broadcast %cst_20 : f32 to vector<1x128xf32>
    %48 = vector.broadcast %cst_21 : f32 to vector<1x128xf32>
    %49 = arith.select %46, %47, %48 : vector<1x128xi1>, vector<1x128xf32>
    %c7_i32_22 = arith.constant 7 : i32
    %50 = vector.broadcast %c7_i32_22 : i32 to vector<1x128xi32>
    %51 = arith.cmpi slt, %30, %50 : vector<1x128xi32>
    %cst_23 = arith.constant 1.000000e+00 : f32
    %cst_24 = arith.constant 0.000000e+00 : f32
    %52 = vector.broadcast %cst_23 : f32 to vector<1x128xf32>
    %53 = vector.broadcast %cst_24 : f32 to vector<1x128xf32>
    %54 = arith.select %51, %52, %53 : vector<1x128xi1>, vector<1x128xf32>
    %c9_i32 = arith.constant 9 : i32
    %55 = tpu.dynamic_rotate %27 by %c9_i32 dim 1 : vector<8x128xf32>, i32 -> vector<8x128xf32>
    %56 = arith.mulf %39, %49 : vector<1x128xf32>
    %57 = vector.broadcast %56 : vector<1x128xf32> to vector<8x128xf32>
    %58 = arith.mulf %55, %57 : vector<8x128xf32>
    %c8_i32 = arith.constant 8 : i32
    %59 = tpu.dynamic_rotate %27 by %c8_i32 dim 1 : vector<8x128xf32>, i32 -> vector<8x128xf32>
    %60 = vector.broadcast %39 : vector<1x128xf32> to vector<8x128xf32>
    %61 = arith.mulf %59, %60 : vector<8x128xf32>
    %c7_i32_25 = arith.constant 7 : i32
    %62 = tpu.dynamic_rotate %27 by %c7_i32_25 dim 1 : vector<8x128xf32>, i32 -> vector<8x128xf32>
    %63 = arith.mulf %39, %54 : vector<1x128xf32>
    %64 = vector.broadcast %63 : vector<1x128xf32> to vector<8x128xf32>
    %65 = arith.mulf %62, %64 : vector<8x128xf32>
    %c1_i32 = arith.constant 1 : i32
    %66 = tpu.dynamic_rotate %27 by %c1_i32 dim 1 : vector<8x128xf32>, i32 -> vector<8x128xf32>
    %67 = vector.broadcast %49 : vector<1x128xf32> to vector<8x128xf32>
    %68 = arith.mulf %66, %67 : vector<8x128xf32>
    %c127_i32 = arith.constant 127 : i32
    %69 = tpu.dynamic_rotate %27 by %c127_i32 dim 1 : vector<8x128xf32>, i32 -> vector<8x128xf32>
    %70 = vector.broadcast %54 : vector<1x128xf32> to vector<8x128xf32>
    %71 = arith.mulf %69, %70 : vector<8x128xf32>
    %c121_i32 = arith.constant 121 : i32
    %72 = tpu.dynamic_rotate %27 by %c121_i32 dim 1 : vector<8x128xf32>, i32 -> vector<8x128xf32>
    %73 = arith.mulf %44, %49 : vector<1x128xf32>
    %74 = vector.broadcast %73 : vector<1x128xf32> to vector<8x128xf32>
    %75 = arith.mulf %72, %74 : vector<8x128xf32>
    %c120_i32 = arith.constant 120 : i32
    %76 = tpu.dynamic_rotate %27 by %c120_i32 dim 1 : vector<8x128xf32>, i32 -> vector<8x128xf32>
    %77 = vector.broadcast %44 : vector<1x128xf32> to vector<8x128xf32>
    %78 = arith.mulf %76, %77 : vector<8x128xf32>
    %c119_i32 = arith.constant 119 : i32
    %79 = tpu.dynamic_rotate %27 by %c119_i32 dim 1 : vector<8x128xf32>, i32 -> vector<8x128xf32>
    %80 = arith.mulf %44, %54 : vector<1x128xf32>
    %81 = vector.broadcast %80 : vector<1x128xf32> to vector<8x128xf32>
    %82 = arith.mulf %79, %81 : vector<8x128xf32>
    %83 = tpu.concatenate %58, %61, %65, %68, %27, %71, %75, %78, %82 in 0 : vector<8x128xf32>, vector<8x128xf32>, vector<8x128xf32>, vector<8x128xf32>, vector<8x128xf32>, vector<8x128xf32>, vector<8x128xf32>, vector<8x128xf32>, vector<8x128xf32> -> vector<72x128xf32>
    %c0_26 = arith.constant 0 : index
    %c0_27 = arith.constant 0 : index
    %84 = vector.load %arg5[%c0_26, %c0_27] : memref<8x72xf32, #tpu.memory_space<vmem>>, vector<8x72xf32>
    %cst_28 = arith.constant dense<0.000000e+00> : vector<8x128xf32>
    %85 = tpu.matmul %84, %83, %cst_28 {dimension_numbers = #tpu.dot_dimension_numbers<[1], [0], [0], [1], [0, 0, 1, 1], [], []>} : vector<8x72xf32>, vector<72x128xf32>, vector<8x128xf32> -> vector<8x128xf32>
    %cst_29 = arith.constant dense<0.000000e+00> : vector<8xf32>
    %86 = vector.multi_reduction <add>, %85, %cst_29 [1] : vector<8x128xf32> to vector<8xf32>
    %87 = vector.shape_cast %86 : vector<8xf32> to vector<8x1xf32>
    %88 = arith.mulf %85, %85 : vector<8x128xf32>
    %cst_30 = arith.constant dense<0.000000e+00> : vector<8xf32>
    %89 = vector.multi_reduction <add>, %88, %cst_30 [1] : vector<8x128xf32> to vector<8xf32>
    %90 = vector.shape_cast %89 : vector<8xf32> to vector<8x1xf32>
    %cst_31 = arith.constant 7.812500e-03 : f32
    %91 = vector.broadcast %cst_31 : f32 to vector<8x1xf32>
    %92 = arith.mulf %87, %91 : vector<8x1xf32>
    %cst_32 = arith.constant 7.812500e-03 : f32
    %93 = vector.broadcast %cst_32 : f32 to vector<8x1xf32>
    %94 = arith.mulf %90, %93 : vector<8x1xf32>
    %95 = arith.mulf %92, %92 : vector<8x1xf32>
    %96 = arith.subf %94, %95 : vector<8x1xf32>
    %c0_33 = arith.constant 0 : index
    %c0_34 = arith.constant 0 : index
    %97 = vector.load %arg6[%c0_33, %c0_34] : memref<8x1xf32, #tpu.memory_space<vmem>>, vector<8x1xf32>
    %cst_35 = arith.constant 9.99999974E-6 : f32
    %98 = vector.broadcast %cst_35 : f32 to vector<8x1xf32>
    %99 = arith.addf %96, %98 : vector<8x1xf32>
    %100 = math.rsqrt %99 : vector<8x1xf32>
    %101 = arith.mulf %97, %100 : vector<8x1xf32>
    %c0_36 = arith.constant 0 : index
    %c0_37 = arith.constant 0 : index
    %102 = vector.load %arg7[%c0_36, %c0_37] : memref<8x1xf32, #tpu.memory_space<vmem>>, vector<8x1xf32>
    %103 = arith.mulf %92, %101 : vector<8x1xf32>
    %104 = arith.subf %102, %103 : vector<8x1xf32>
    %105 = vector.broadcast %101 : vector<8x1xf32> to vector<8x128xf32>
    %106 = arith.mulf %85, %105 : vector<8x128xf32>
    %107 = vector.broadcast %104 : vector<8x1xf32> to vector<8x128xf32>
    %108 = arith.addf %106, %107 : vector<8x128xf32>
    %cst_38 = arith.constant 0.000000e+00 : f32
    %109 = vector.broadcast %cst_38 : f32 to vector<8x128xf32>
    %110 = arith.maximumf %108, %109 : vector<8x128xf32>
    %c0_39 = arith.constant 0 : index
    %c0_40 = arith.constant 0 : index
    %111 = vector.load %arg8[%c0_39, %c0_40] : memref<16x8xf32, #tpu.memory_space<vmem>>, vector<16x8xf32>
    %cst_41 = arith.constant dense<0.000000e+00> : vector<16x128xf32>
    %112 = tpu.matmul %111, %110, %cst_41 {dimension_numbers = #tpu.dot_dimension_numbers<[1], [0], [0], [1], [0, 0, 1, 1], [], []>} : vector<16x8xf32>, vector<8x128xf32>, vector<16x128xf32> -> vector<16x128xf32>
    %cst_42 = arith.constant dense<0.000000e+00> : vector<16xf32>
    %113 = vector.multi_reduction <add>, %112, %cst_42 [1] : vector<16x128xf32> to vector<16xf32>
    %114 = vector.shape_cast %113 : vector<16xf32> to vector<16x1xf32>
    %115 = arith.mulf %112, %112 : vector<16x128xf32>
    %cst_43 = arith.constant dense<0.000000e+00> : vector<16xf32>
    %116 = vector.multi_reduction <add>, %115, %cst_43 [1] : vector<16x128xf32> to vector<16xf32>
    %117 = vector.shape_cast %116 : vector<16xf32> to vector<16x1xf32>
    %cst_44 = arith.constant 7.812500e-03 : f32
    %118 = vector.broadcast %cst_44 : f32 to vector<16x1xf32>
    %119 = arith.mulf %114, %118 : vector<16x1xf32>
    %cst_45 = arith.constant 7.812500e-03 : f32
    %120 = vector.broadcast %cst_45 : f32 to vector<16x1xf32>
    %121 = arith.mulf %117, %120 : vector<16x1xf32>
    %122 = arith.mulf %119, %119 : vector<16x1xf32>
    %123 = arith.subf %121, %122 : vector<16x1xf32>
    %c0_46 = arith.constant 0 : index
    %c0_47 = arith.constant 0 : index
    %124 = vector.load %arg9[%c0_46, %c0_47] : memref<16x1xf32, #tpu.memory_space<vmem>>, vector<16x1xf32>
    %cst_48 = arith.constant 9.99999974E-6 : f32
    %125 = vector.broadcast %cst_48 : f32 to vector<16x1xf32>
    %126 = arith.addf %123, %125 : vector<16x1xf32>
    %127 = math.rsqrt %126 : vector<16x1xf32>
    %128 = arith.mulf %124, %127 : vector<16x1xf32>
    %c0_49 = arith.constant 0 : index
    %c0_50 = arith.constant 0 : index
    %129 = vector.load %arg10[%c0_49, %c0_50] : memref<16x1xf32, #tpu.memory_space<vmem>>, vector<16x1xf32>
    %130 = arith.mulf %119, %128 : vector<16x1xf32>
    %131 = arith.subf %129, %130 : vector<16x1xf32>
    %132 = vector.broadcast %128 : vector<16x1xf32> to vector<16x128xf32>
    %133 = arith.mulf %112, %132 : vector<16x128xf32>
    %134 = vector.broadcast %131 : vector<16x1xf32> to vector<16x128xf32>
    %135 = arith.addf %133, %134 : vector<16x128xf32>
    %c0_51 = arith.constant 0 : index
    %c0_52 = arith.constant 0 : index
    %136 = vector.load %arg1[%c0_51, %c0_52] : memref<16x128xf32, #tpu.memory_space<vmem>>, vector<16x128xf32>
    %137 = arith.addf %135, %136 : vector<16x128xf32>
    %cst_53 = arith.constant 0.000000e+00 : f32
    %138 = vector.broadcast %cst_53 : f32 to vector<16x128xf32>
    %139 = arith.maximumf %137, %138 : vector<16x128xf32>
    %c0_54 = arith.constant 0 : index
    %c0_55 = arith.constant 0 : index
    %140 = vector.load %arg11[%c0_54, %c0_55] : memref<16x128xf32, #tpu.memory_space<vmem>>, vector<16x128xf32>
    tpu.vector_store %arg11[%c0_54, %c0_55], %139 {strides = array<i32>} : memref<16x128xf32, #tpu.memory_space<vmem>>, vector<16x128xf32>,
    return
  }
  func.func @transform_0(%arg0: i32) -> (i32, i32) {
    %c0_i32 = arith.constant 0 : i32
    %c0_i32_0 = arith.constant 0 : i32
    %c0_i32_1 = arith.constant 0 : i32
    return %c0_i32, %c0_i32_0 : i32, i32
  }
  func.func @transform_1(%arg0: i32) -> (i32, i32) {
    %c0_i32 = arith.constant 0 : i32
    %c0_i32_0 = arith.constant 0 : i32
    %c0_i32_1 = arith.constant 0 : i32
    return %c0_i32, %c0_i32_0 : i32, i32
  }
  func.func @transform_2(%arg0: i32) -> (i32, i32) {
    %c0_i32 = arith.constant 0 : i32
    %c0_i32_0 = arith.constant 0 : i32
    %c0_i32_1 = arith.constant 0 : i32
    return %c0_i32, %c0_i32_0 : i32, i32
  }
  func.func @transform_3(%arg0: i32) -> (i32, i32) {
    %c0_i32 = arith.constant 0 : i32
    %c0_i32_0 = arith.constant 0 : i32
    %c0_i32_1 = arith.constant 0 : i32
    return %c0_i32, %c0_i32_0 : i32, i32
  }
  func.func @transform_4(%arg0: i32) -> (i32, i32) {
    %c0_i32 = arith.constant 0 : i32
    %c0_i32_0 = arith.constant 0 : i32
    %c0_i32_1 = arith.constant 0 : i32
    return %c0_i32, %c0_i32_0 : i32, i32
  }
  func.func @transform_5(%arg0: i32) -> (i32, i32) {
    %c0_i32 = arith.constant 0 : i32
    %c0_i32_0 = arith.constant 0 : i32
    %c0_i32_1 = arith.constant 0 : i32
    return %c0_i32, %c0_i32_0 : i32, i32
  }
  func.func @transform_6(%arg0: i32) -> (i32, i32) {
    %c0_i32 = arith.constant 0 : i32
    %c0_i32_0 = arith.constant 0 : i32
    %c0_i32_1 = arith.constant 0 : i32
    return %c0_i32, %c0_i32_0 : i32, i32
  }
  func.func @transform_7(%arg0: i32) -> (i32, i32) {
    %c0_i32 = arith.constant 0 : i32
    %c0_i32_0 = arith.constant 0 : i32
    %c0_i32_1 = arith.constant 0 : i32
    return %c0_i32, %c0_i32_0 : i32, i32
  }
  func.func @transform_8(%arg0: i32) -> (i32, i32) {
    %c0_i32 = arith.constant 0 : i32
    %c0_i32_0 = arith.constant 0 : i32
    %c0_i32_1 = arith.constant 0 : i32
    return %c0_i32, %c0_i32_0 : i32, i32
  }
  func.func @transform_9(%arg0: i32) -> (i32, i32) {
    %c0_i32 = arith.constant 0 : i32
    %c0_i32_0 = arith.constant 0 : i32
    %c0_i32_1 = arith.constant 0 : i32
    return %c0_i32, %c0_i32_0 : i32, i32
  }
  func.func @transform_10(%arg0: i32) -> (i32, i32) {
    %c0_i32 = arith.constant 0 : i32
    %c0_i32_0 = arith.constant 0 : i32
    %c0_i32_1 = arith.constant 0 : i32
    return %c0_i32, %c0_i32_0 : i32, i32
  }
}

</mosaic_0001>

<bundles_post_ra>
// kernel: tpu_custom_call.1
= control target key start
LH: loop header
LB: loop body
LE: loop exit
PB: predicated region body
PF: predicated region fallthrough
CT: control target
= control target key end

     0   :  { %v565_v2 = vmov 0.0|0.0   ;;  %vm566_vm0 = vmmov 0   ;;  %v567_v4 = vmov 0.0   ;;  %s710_s0 = inlined_call_operand.vmem [shape: f32[16,128], index: 0, kind: input, shape index: {}]   ;;  %s711_s1 = inlined_call_operand.vmem [shape: f32[8,16], index: 1, kind: input, shape index: {}]   ;;  %s712_s2 = inlined_call_operand.vmem [shape: f32[8,1], index: 2, kind: input, shape index: {}]   ;;  %s713_s3 = inlined_call_operand.vmem [shape: f32[8,1], index: 3, kind: input, shape index: {}]   ;;  %s714_s4 = inlined_call_operand.vmem [shape: f32[8,72], index: 4, kind: input, shape index: {}]   ;;  %s715_s5 = inlined_call_operand.vmem [shape: f32[8,1], index: 5, kind: input, shape index: {}]   ;;  %s716_s6 = inlined_call_operand.vmem [shape: f32[8,1], index: 6, kind: input, shape index: {}]   ;;  %s717_s7 = inlined_call_operand.vmem [shape: f32[16,8], index: 7, kind: input, shape index: {}]   ;;  %s718_s8 = inlined_call_operand.vmem [shape: f32[16,1], index: 8, kind: input, shape index: {}]   ;;  %s719_s9 = inlined_call_operand.vmem [shape: f32[16,1], index: 9, kind: input, shape index: {}]   ;;  %s720_s10 = inlined_call_operand.hbm [shape: f32[16,128], index: 10, kind: output, shape index: {}]  }
   0x1   :  { %v637_v0 = vld [vmem:[%s710_s0] sm:$0xff]  ;;  %v642_v1 = vld [vmem:[%s710_s0 + $0x8] sm:$0xff]  ;;  %502 = vmatprep.subr.bf16.mxu0 %v565_v2  ;;  %473 = vmatprep.mubr.msk.f32.mxu0 %vm566_vm0, %v567_v4 }
   0x2   :  { %v503_v3 = vpack.c.bf16 %v642_v1, %v637_v0 }
   0x3   :  { %15 = vsyncpa [#allocation3], 0  ;;  %505 = vmatprep.subr.bf16.mxu1 %v565_v2  ;;  %494 = vmatprep.mubr.msk.f32.mxu1 %vm566_vm0, %v567_v4  ;;  %v36_v5 = vld [vmem:[%s711_s1] sm:$0xff]  ;;  %vm39_vm1 = vcmask 130048   ;;  %v568_v9 = vmov 0   ;;  %s569_s21 = smov 8   ;;  %v142_v28 = vlaneseq }
   0x4   :  { %504 = vmatpush3.bf16.msra.mxu0 %v503_v3  ;;  %531 = vset.pattern.permute.xlu1 %v568_v9  ;;  %v122_v17 = vld [vmem:[%s712_s2] sm:$0xff]  ;;  %s570_s22 = smov 9   ;;  %s571_s2 = smov 7   ;;  %vm184_vm6 = vcmask 588800   ;;  %vm289_vm7 = vcmask 64512  }
   0x5   :  { %532 = vset.pattern.permute.xlu0 %v568_v9  ;;  %v126_v20 = vld [vmem:[%s713_s3] sm:$0xff]  ;;  %s572_s23 = smov 119   ;;  %s573_s24 = smov 1   ;;  %v143_v29 = vand.u32 127, %v142_v28 }
   0x6   :  { %s574_s3 = smov 127   ;;  %s575_s25 = smov 121   ;;  %v183_v61 = vld [vmem:[%s714_s4] sm:$0xff] }
   0x7   :  { %474 = vmatmul.mubr.msk.f32.vlgmr.msra.gmra.mrb[0].mxu0 %vm39_vm1, %v36_v5  ;;  %s576_s26 = smov 120   ;;  %v145_v30 = vshra.s32 %v143_v29, 3  ;;  %v144_v32 = vand.u32 7, %v143_v29 }
   0x9   :  { %v146_v31 = vand.u32 7, %v145_v30  ;;  %vm151_vm3 = vcmp.gt.s32.totalorder %v144_v32, 0  ;;  %vm153_vm4 = vcmp.lt.s32.totalorder %v144_v32, 7 }
   0xa   :  { %v152_v34 = vsel %vm151_vm3, 1.0, %v567_v4  ;;  %v154_v40 = vsel %vm153_vm4, 1.0, %v567_v4 }
   0xb   :  { %vm147_vm2 = vcmp.gt.s32.totalorder %v146_v31, 0  ;;  %vm149_vm5 = vcmp.lt.s32.totalorder %v146_v31, 7 }
   0xc   :  { %v148_v33 = vsel %vm147_vm2, 1.0, %v567_v4  ;;  %v150_v51 = vsel %vm149_vm5, 1.0, %v567_v4 }
   0xd   :  { %v157_v35 = vmul.f32 %v152_v34, %v148_v33  ;;  %v164_v43 = vmul.f32 %v154_v40, %v148_v33  ;;  %v174_v53 = vmul.f32 %v152_v34, %v150_v51  ;;  %v181_v57 = vmul.f32 %v154_v40, %v150_v51 }
  0xda   :  { %v109_v6 = vpop.f32.mrb[0].mxu0 }
  0xdb   :  { %113 = vadd.xlane.f32.xlu0 %v109_v6  ;;  %v475_v7 = vpop.f32.mrb[1].mxu0  ;;  %v115_v8 = vmul.f32 %v109_v6, %v109_v6 }
  0xdf   :  { %116 = vadd.xlane.f32.xlu0 %v115_v8 }
 0x168   :  { %v114_v10 = vpop.xlane.xlu0 %113 }
 0x169   :  { %v118_v11 = vmul.f32 0.0078125, %v114_v10  ;;  %v267_v10 = vld [vmem:[%s715_s5] sm:$0xff] }
 0x16b   :  { %v120_v13 = vmul.f32 %v118_v11, %v118_v11 }
 0x16c   :  { %v117_v12 = vpop.xlane.xlu0 %116 }
 0x16d   :  { %v119_v14 = vmul.f32 0.0078125, %v117_v12 }
 0x16f   :  { %v121_v15 = vsub.f32 %v119_v14, %v120_v13  ;;  %v271_v13 = vld [vmem:[%s716_s6] sm:$0xff] }
 0x171   :  { %v123_v16 = vadd.f32 1e-05, %v121_v15 }
 0x173   :  { %533 = vrsqrt.f32 %v123_v16  ;;  %v287_v16 = vld [vmem:[%s717_s7] sm:$0xff] }
 0x174   :  { %499 = vmatprep.mubr.msk.f32.mxu0 %vm289_vm7, %v287_v16 }
 0x17d   :  { %v534_v18 = vpop.eup %533 }
 0x17e   :  { %v125_v19 = vmul.f32 %v534_v18, %v122_v17 }
 0x180   :  { %131 = vperm.xlu1 %531, %v125_v19   ;;  %v127_v21 = vmul.f32 %v125_v19, %v118_v11 }
 0x182   :  { %v128_v22 = vsub.f32 %v126_v20, %v127_v21 }
 0x184   :  { %137 = vperm.xlu1 %531, %v128_v22   ;;  %v288_v22 = vld [vmem:[%s717_s7 + $0x8] sm:$0xff] }
 0x1ff   :  { %v132_v23 = vpop.permute.xlu1 %131 }
 0x200   :  { %v134_v24 = vmul.f32 %v132_v23, %v109_v6 }
 0x203   :  { %v138_v25 = vpop.permute.xlu1 %137 }
 0x204   :  { %v140_v26 = vadd.f32 %v138_v25, %v134_v24 }
 0x206   :  { %v141_v27 = vmax.f32 %v140_v26, 0.0 }
 0x208   :  { %159 = vrot.lane.b32.xlu1 %v141_v27, %s569_s21  ;;  %155 = vrot.lane.b32.xlu0 %v141_v27, %s570_s22 }
 0x20c   :  { %162 = vrot.lane.b32.xlu1 %v141_v27, %s571_s2  ;;  %179 = vrot.lane.b32.xlu0 %v141_v27, %s572_s23 }
 0x210   :  { %166 = vrot.lane.b32.xlu1 %v141_v27, %s573_s24 }
 0x214   :  { %169 = vrot.lane.b32.xlu1 %v141_v27, %s574_s3 }
 0x218   :  { %172 = vrot.lane.b32.xlu1 %v141_v27, %s575_s25 }
 0x21c   :  { %176 = vrot.lane.b32.xlu1 %v141_v27, %s576_s26 }
 0x27a   :  { %v160_v36 = vpop.permute.xlu1 %159  ;;  %v156_v37 = vpop.permute.xlu0 %155 }
 0x27b   :  { %v161_v38 = vmul.f32 %v160_v36, %v148_v33  ;;  %v158_v39 = vmul.f32 %v157_v35, %v156_v37 }
 0x27d   :  { %v506_v41 = vpack.c.bf16 %v161_v38, %v158_v39 }
 0x27e   :  { %v163_v42 = vpop.permute.xlu1 %162  ;;  %v180_v59 = vpop.permute.xlu0 %179 }
 0x27f   :  { %507 = vmatpush3.bf16.msra.mxu1 %v506_v41  ;;  %v165_v45 = vmul.f32 %v164_v43, %v163_v42  ;;  %v182_v60 = vmul.f32 %v181_v57, %v180_v59  ;;  %v389_v41 = vld [vmem:[%s718_s8] sm:$0xff] }
 0x280   :  { %508 = vmatprep.subr.bf16.mxu1 %v565_v2 }
 0x282   :  { %v167_v44 = vpop.permute.xlu1 %166 }
 0x283   :  { %v168_v46 = vmul.f32 %v167_v44, %v152_v34  ;;  %v397_v44 = vld [vmem:[%s719_s9] sm:$0xff] }
 0x285   :  { %v509_v47 = vpack.c.bf16 %v168_v46, %v165_v45  ;;  %v390_v45 = vld [vmem:[%s718_s8 + $0x8] sm:$0xff]  ;;  %s577_s8 = smov [#allocation2]  }
 0x286   :  { %v170_v48 = vpop.permute.xlu1 %169  ;;  %s438_s19 = sshll.u32 %s577_s8, 4  ;;  %s439_s19 = int_to_ptr.vmem [resolvable:$true] %s438_s19 }
 0x287   :  { %v171_v49 = vmul.f32 %v170_v48, %v154_v40  ;;  %510 = vmatpush3.bf16.msra.mxu1 %v509_v47  ;;  %p546_p1 = scmp.lt.s32.totalorder %s439_s19, %s439_s19 }
 0x288   :  { %511 = vmatprep.subr.bf16.mxu1 %v565_v2 }
 0x289   :  { %v512_v50 = vpack.c.bf16 %v171_v49, %v141_v27 }
 0x28a   :  { %v173_v52 = vpop.permute.xlu1 %172 }
 0x28b   :  { %513 = vmatpush3.bf16.msra.mxu1 %v512_v50  ;;  %v175_v55 = vmul.f32 %v174_v53, %v173_v52  ;;  %v398_v50 = vld [vmem:[%s719_s9 + $0x8] sm:$0xff]  ;;  %s541_s9 = scalar_lea.vmem %s439_s19, 256 }
 0x28c   :  { %514 = vmatprep.subr.bf16.mxu1 %v565_v2  ;;  %p542_p0 = scmp.ne.s32.totalorder %s439_s19, %s541_s9  ;;  %p547_p2 = scmp.lt.s32.totalorder %s541_s9, %s541_s9 }
 0x28e   :  { %v177_v54 = vpop.permute.xlu1 %176  ;;  %p548_p3 = por %p547_p2, %p546_p1 }
 0x28f   :  { %v178_v56 = vmul.f32 %v177_v54, %v150_v51 }
 0x290   :  { %p549_p4 = pnand %p548_p3, %p542_p0 }
 0x291   :  { %v515_v58 = vpack.c.bf16 %v178_v56, %v175_v55 }
 0x293   :  { %516 = vmatpush3.bf16.msra.mxu1 %v515_v58 }
 0x294   :  { %492 = vmatprep.subr.mxu1 %v567_v4 }
 0x297   :  { %493 = vmatpush3.msra.mxu1 %v182_v60 }
 0x298   :  { %495 = vmatmul.mubr.msk.f32.vlgmr.msra.gmra.mrb[0].mxu1 %vm184_vm6, %v183_v61 }
 0x36b   :  { %v254_v62 = vpop.f32.mrb[0].mxu1 }
 0x36c   :  { %258 = vadd.xlane.f32.xlu1 %v254_v62  ;;  %v496_v63 = vpop.f32.mrb[1].mxu1  ;;  %v260_v2 = vmul.f32 %v254_v62, %v254_v62 }
 0x36e   :  { %261 = vadd.xlane.f32.xlu0 %v260_v2 }
 0x3f9   :  { %v259_v3 = vpop.xlane.xlu1 %258 }
 0x3fa   :  { %v263_v5 = vmul.f32 0.0078125, %v259_v3 }
 0x3fb   :  { %v262_v6 = vpop.xlane.xlu0 %261 }
 0x3fc   :  { %v265_v7 = vmul.f32 %v263_v5, %v263_v5  ;;  %v264_v8 = vmul.f32 0.0078125, %v262_v6 }
 0x3fe   :  { %v266_v9 = vsub.f32 %v264_v8, %v265_v7 }
 0x400   :  { %v268_v4 = vadd.f32 1e-05, %v266_v9 }
 0x402   :  { %535 = vrsqrt.f32 %v268_v4 }
 0x40c   :  { %v536_v11 = vpop.eup %535 }
 0x40d   :  { %v270_v12 = vmul.f32 %v536_v11, %v267_v10 }
 0x40f   :  { %276 = vperm.xlu0 %532, %v270_v12   ;;  %v272_v14 = vmul.f32 %v270_v12, %v263_v5 }
 0x411   :  { %v273_v15 = vsub.f32 %v271_v13, %v272_v14 }
 0x413   :  { %282 = vperm.xlu1 %531, %v273_v15  }
 0x48e   :  { %v277_v17 = vpop.permute.xlu0 %276 }
 0x48f   :  { %v279_v18 = vmul.f32 %v277_v17, %v254_v62 }
 0x492   :  { %v283_v19 = vpop.permute.xlu1 %282 }
 0x493   :  { %v285_v20 = vadd.f32 %v283_v19, %v279_v18 }
 0x495   :  { %v286_v21 = vmax.f32 %v285_v20, 0.0 }
 0x497   :  { %497 = vmatprep.subr.mxu0 %v286_v21 }
 0x498   :  { %498 = vmatpush3.msra.mxu0 %v286_v21 }
 0x499   :  { %500 = vmatmul.mubr.msk.f32.vlgmr.msra.gmra.mrb[2].mxu0 %vm289_vm7, %v288_v22 }
 0x56c   :  { %v501_v23 = vpop.f32.mrb[2].mxu0 }
 0x56d   :  { %v362_v24 = vpop.f32.mrb[3].mxu0  ;;  %373 = vadd.xlane.f32.xlu0 %v501_v23  ;;  %v376_v26 = vmul.f32 %v501_v23, %v501_v23 }
 0x56e   :  { %371 = vadd.xlane.f32.xlu1 %v362_v24  ;;  %v375_v25 = vmul.f32 %v362_v24, %v362_v24 }
 0x572   :  { %377 = vadd.xlane.f32.xlu1 %v375_v25 }
 0x576   :  { %379 = vadd.xlane.f32.xlu1 %v376_v26 }
 0x5fa   :  { %v374_v29 = vpop.xlane.xlu0 %373 }
 0x5fb   :  { %v372_v27 = vpop.xlane.xlu1 %371  ;;  %v382_v32 = vmul.f32 0.0078125, %v374_v29 }
 0x5fc   :  { %v381_v28 = vmul.f32 0.0078125, %v372_v27 }
 0x5fd   :  { %v386_v36 = vmul.f32 %v382_v32, %v382_v32 }
 0x5fe   :  { %v385_v31 = vmul.f32 %v381_v28, %v381_v28 }
 0x5ff   :  { %v378_v30 = vpop.xlane.xlu1 %377 }
 0x600   :  { %v383_v33 = vmul.f32 0.0078125, %v378_v30 }
 0x602   :  { %v387_v34 = vsub.f32 %v383_v33, %v385_v31 }
 0x603   :  { %v380_v35 = vpop.xlane.xlu1 %379 }
 0x604   :  { %v391_v37 = vadd.f32 1e-05, %v387_v34  ;;  %v384_v38 = vmul.f32 0.0078125, %v380_v35 }
 0x606   :  { %537 = vrsqrt.f32 %v391_v37  ;;  %v388_v39 = vsub.f32 %v384_v38, %v386_v36 }
 0x608   :  { %v392_v40 = vadd.f32 1e-05, %v388_v39 }
 0x60a   :  { %539 = vrsqrt.f32 %v392_v40 }
 0x610   :  { %v538_v42 = vpop.eup %537 }
 0x611   :  { %v395_v43 = vmul.f32 %v538_v42, %v389_v41 }
 0x613   :  { %405 = vperm.xlu1 %531, %v395_v43   ;;  %v399_v46 = vmul.f32 %v395_v43, %v381_v28 }
 0x614   :  { %v540_v47 = vpop.eup %539 }
 0x615   :  { %v401_v48 = vsub.f32 %v397_v44, %v399_v46  ;;  %v396_v49 = vmul.f32 %v540_v47, %v390_v45 }
 0x617   :  { %417 = vperm.xlu1 %531, %v401_v48   ;;  %410 = vperm.xlu0 %532, %v396_v49   ;;  %v400_v51 = vmul.f32 %v396_v49, %v382_v32 }
 0x619   :  { %v402_v52 = vsub.f32 %v398_v50, %v400_v51 }
 0x61b   :  { %422 = vperm.xlu1 %531, %v402_v52  }
 0x692   :  { %v406_v53 = vpop.permute.xlu1 %405 }
 0x693   :  { %v413_v54 = vmul.f32 %v406_v53, %v362_v24 }
 0x696   :  { %v411_v55 = vpop.permute.xlu0 %410  ;;  %v418_v56 = vpop.permute.xlu1 %417 }
 0x697   :  { %v425_v57 = vadd.f32 %v418_v56, %v413_v54  ;;  %v414_v58 = vmul.f32 %v501_v23, %v411_v55 }
 0x699   :  { %v427_v59 = vadd.f32 %v425_v57, %v637_v0 }
 0x69a   :  { %v423_v60 = vpop.permute.xlu1 %422 }
 0x69b   :  { %v429_v61 = vmax.f32 %v427_v59, 0.0  ;;  %v426_v62 = vadd.f32 %v423_v60, %v414_v58 }
 0x69d   :  { %431 = vst [vmem:[#allocation2] sm:$0xff] %v429_v61  ;;  %v428_v63 = vadd.f32 %v426_v62, %v642_v1 }
 0x69f   :  { %v430_v2 = vmax.f32 %v428_v63, 0.0 }
 0x6a1   :  { %432 = vst [vmem:[#allocation2 + $0x8] sm:$0xff] %v430_v2 }
 0x6a2   :  { %552 = shalt.err (!%p549_p4)
}
 0x6a3   :  { %s553_s2 = scalar_lea.hbm %s720_s10, 256 }
 0x6a4   :  { %p554_p5 = scmp.ne.s32.totalorder %s720_s10, %s553_s2  ;;  %p557_p6 = scmp.lt.u32.totalorder %s553_s2, %s720_s10 }
 0x6a6   :  { %p559_p7 = pnand %p557_p6, %p554_p5 }
 0x6a8   :  { %562 = shalt.err (!%p559_p7)
}
 0x6a9   :  { %s578_s26 = smov 128  }
 0x6aa   :  { %444 = dma.vmem_to_hbm [thread:$0]  %s439_s19, 256, %s720_s10, [#allocation3], %s578_s26, %s578_s26, %s569_s21  }
 0x6ab   :  { %563 = dma.done.wait [#allocation3], 256  }
 0x6ac   :  { %564 = vsyncadd [#allocation3], 4294967040 }
 0x6ad   :  { %448 = vsyncpa [#allocation3], 1 }

</bundles_post_ra>
